<compile_context>
chip_gen: v6e
topology: v6e:2x2x1
jax: 0.10.0
libtpu: 0.0.40
codegen_flags: <defaults>
</compile_context>

<pallas_src>
import functools

import jax
import jax.numpy as jnp
from jax.experimental import pallas as pl
from jax.experimental.pallas import tpu as pltpu


# Set to False for exact-division softmax (numerical parity vs the reference);
# True uses the EUP approximate reciprocal (~1e-3 relative difference).
_APPROX_SOFTMAX = True


# ----------------------------- fused Pallas kernel -----------------------------

def _fused_forward_kernel(fuse_in_ref, fw_ref, fb_ref, gd_ref,
                          w0_ref, b0_ref, w1_ref, b1_ref,
                          embs_ref, pred_ref, *, approx_softmax=True):
    n = pred_ref.shape[0]
    num_layers = w0_ref.shape[0]

    # --- fuse_seq: one (N, 3D) @ (3D, D) matmul + bias ----------------------
    x = (jnp.dot(fuse_in_ref[...], fw_ref[...], preferred_element_type=jnp.float32)
         + fb_ref[...])

    # --- pred_g = relu(softmax(X @ X^T, axis=1) - 0.2) ----------------------
    # dot_general contracting last dims of both operands == X @ X^T, no .T op.
    scores = jax.lax.dot_general(x, x, (((1,), (1,)), ((), ())),
                                 preferred_element_type=jnp.float32)
    scores = scores - jnp.max(scores, axis=1, keepdims=True)
    ex = jnp.exp(scores)
    denom = jnp.sum(ex, axis=1, keepdims=True)
    if approx_softmax:
        sm = ex * pl.reciprocal(denom, approx=True)
    else:
        sm = ex / denom
    pred_g = jnp.maximum(sm - 0.2, 0.0)
    pred_ref[...] = pred_g

    # --- shared constants for both GCN normalizations -----------------------
    eye = (jax.lax.broadcasted_iota(jnp.int32, (n, n), 0)
           == jax.lax.broadcasted_iota(jnp.int32, (n, n), 1))
    eye_f32 = jnp.where(eye, 1.0, 0.0)
    ones_col = jnp.ones((n, 1), jnp.float32)

    def gcn_norm_q(a):
        # Dense PyG gcn_norm on dense_to_sparse(A):
        #   edge j->i carries weight A[j, i]; remaining self-loops get weight 1;
        #   deg_i = sum_j A_sl[j, i] (incoming);
        #   Q[j, i] = deg_j^{-1/2} * A_sl[j, i] * deg_i^{-1/2}.
        # The propagation matrix is P = Q^T; downstream we contract Q's first
        # axis (P @ X) via dot_general so no transpose is materialized.
        # NOTE: 0.0 means "no edge" in this dense representation (exact compare).
        a_sl = jnp.where(eye & (a == 0.0), 1.0, a)
        # Incoming degrees once, as a column vector [N, 1] (MXU matvec).
        deg_col = jax.lax.dot_general(a_sl, ones_col, (((0,), (0,)), ((), ())),
                                      preferred_element_type=jnp.float32)
        dis_col = jax.lax.rsqrt(deg_col)                                    # [N, 1]
        # Same values as a [1, N] row view: dis_col^T @ I (one MXU push),
        # instead of a second cross-sublane reduce + second rsqrt.
        dis_row = jax.lax.dot_general(dis_col, eye_f32, (((0,), (0,)), ((), ())),
                                      preferred_element_type=jnp.float32)   # [1, N]
        return dis_col * a_sl * dis_row

    q_pred = gcn_norm_q(pred_g)
    q_gd = gcn_norm_q(gd_ref[...])

    # --- stacked GCNConv layers + 0.9/0.1 residual mix -----------------------
    def gnn_stack(q, w_ref, b_ref):
        def body(l, h):
            hw = jnp.dot(h, w_ref[l], preferred_element_type=jnp.float32)
            # P @ (H W) with P = Q^T: contract dim 0 of Q with dim 0 of HW.
            agg = jax.lax.dot_general(q, hw, (((0,), (0,)), ((), ())),
                                      preferred_element_type=jnp.float32) + b_ref[l]
            return 0.9 * agg + 0.1 * h
        return jax.lax.fori_loop(0, num_layers, body, x, unroll=True)

    embs_ref[...] = gnn_stack(q_pred, w0_ref, b0_ref) + gnn_stack(q_gd, w1_ref, b1_ref)


# ----------------------------- AdaptiveGraph forward -----------------------------

@jax.jit
def adaptive_graph_forward(params, demand_seq_emb, supply_seq_emb, gd_adj):
    e1 = params["skill_emb_1"]
    n, d = e1.shape

    demand_last = demand_seq_emb[:, -1, :]     # [N, D]
    supply_last = supply_seq_emb[:, -1, :]     # [N, D]
    # Merge the three fuse_seq operands once in the wrapper (tiny XLA concat),
    # so the kernel issues a single MXU push for fuse_seq.
    fuse_in = jnp.concatenate([e1, demand_last, supply_last], axis=-1)   # [N, 3D]

    kernel = functools.partial(_fused_forward_kernel, approx_softmax=_APPROX_SOFTMAX)

    # Gridless call: every operand resident whole in VMEM, no pipelining machinery.
    vmem = pl.BlockSpec(memory_space=pltpu.MemorySpace.VMEM)

    skill_embs, pred_g = pl.pallas_call(
        kernel,
        out_shape=(jax.ShapeDtypeStruct((n, d), jnp.float32),
                   jax.ShapeDtypeStruct((n, n), jnp.float32)),
        in_specs=[vmem] * 8,
        out_specs=(vmem, vmem),
    )(fuse_in,
      params["fuse_seq_w"], params["fuse_seq_b"], gd_adj,
      params["gnn0_w"], params["gnn0_b"], params["gnn1_w"], params["gnn1_b"])

    loss = jnp.float32(0.0)
    return e1, skill_embs, pred_g, loss


# ----------------------------- parameter / input setup -----------------------------

def init_params(key, skill_num, dim, gcn_layers):
    ks = jax.random.split(key, 8)
    scale = 0.1
    params = {
        "skill_emb_1": scale * jax.random.normal(ks[0], (skill_num, dim), jnp.float32),
        "skill_emb_2": scale * jax.random.normal(ks[1], (skill_num, dim), jnp.float32),
        # fuse_seq: torch.nn.Linear(3*dim, dim); stored as [in, out] so y = x @ W + b
        "fuse_seq_w": scale * jax.random.normal(ks[2], (3 * dim, dim), jnp.float32),
        "fuse_seq_b": scale * jax.random.normal(ks[3], (1, dim), jnp.float32),
        # GCNConv weights/biases stacked per layer: [L, in, out] / [L, 1, out]
        "gnn0_w": scale * jax.random.normal(ks[4], (gcn_layers, dim, dim), jnp.float32),
        "gnn0_b": scale * jax.random.normal(ks[5], (gcn_layers, 1, dim), jnp.float32),
        "gnn1_w": scale * jax.random.normal(ks[6], (gcn_layers, dim, dim), jnp.float32),
        "gnn1_b": scale * jax.random.normal(ks[7], (gcn_layers, 1, dim), jnp.float32),
        # fuse_E1_E2 / fuse_seq_node exist in __init__ but are unused in forward.
    }
    return params


if __name__ == "__main__":
    skill_num = 16        # N (number of skill nodes)
    skill_embed_dim = 32  # D
    seq_len = 8
    gcn_layers = 2
    sample_node_num = 4   # unused in forward (as in the reference module)

    key = jax.random.PRNGKey(0)
    k_par, k_d, k_s, k_gv, k_gm = jax.random.split(key, 5)

    params = init_params(k_par, skill_num, skill_embed_dim, gcn_layers)

    demand_seq_emb = jax.random.normal(k_d, (skill_num, seq_len, skill_embed_dim), jnp.float32)
    supply_seq_emb = jax.random.normal(k_s, (skill_num, seq_len, skill_embed_dim), jnp.float32)

    # Synthetic dense g_d adjacency (edges already restricted to nodes < skill_num),
    # with non-negative edge_attr weights; 0.0 denotes "no edge".
    gd_vals = jax.random.uniform(k_gv, (skill_num, skill_num), jnp.float32)
    gd_mask = jax.random.uniform(k_gm, (skill_num, skill_num), jnp.float32) < 0.3
    gd_adj = jnp.where(gd_mask, gd_vals, 0.0)

    skill_emb_1, skill_embs, pred_g, loss = adaptive_graph_forward(
        params, demand_seq_emb, supply_seq_emb, gd_adj)

    jax.block_until_ready((skill_emb_1, skill_embs, pred_g, loss))
    assert skill_embs.shape == (skill_num, skill_embed_dim)
    assert pred_g.shape == (skill_num, skill_num)
    assert bool(jnp.all(jnp.isfinite(skill_embs)))
    assert bool(jnp.all(jnp.isfinite(pred_g)))
    print("KERNEL_OK")
</pallas_src>

<mosaic_0001>
module attributes {stable_mosaic.version = 11 : i64} {
  func.func @_fused_forward_kernel(%arg0: memref<16x96xf32, #tpu.memory_space<vmem>>, %arg1: memref<96x32xf32, #tpu.memory_space<vmem>>, %arg2: memref<1x32xf32, #tpu.memory_space<vmem>>, %arg3: memref<16x16xf32, #tpu.memory_space<vmem>>, %arg4: memref<2x32x32xf32, #tpu.memory_space<vmem>>, %arg5: memref<2x1x32xf32, #tpu.memory_space<vmem>>, %arg6: memref<2x32x32xf32, #tpu.memory_space<vmem>>, %arg7: memref<2x1x32xf32, #tpu.memory_space<vmem>>, %arg8: memref<16x32xf32, #tpu.memory_space<vmem>>, %arg9: memref<16x16xf32, #tpu.memory_space<vmem>>) attributes {dimension_semantics = [], scalar_prefetch = 0 : i64, scratch_operands = 0 : i64, tpu.core_type = #tpu.core_type<tc>} {
    %c0 = arith.constant 0 : index
    %c0_0 = arith.constant 0 : index
    %0 = vector.load %arg0[%c0, %c0_0] : memref<16x96xf32, #tpu.memory_space<vmem>>, vector<16x96xf32>
    %c0_1 = arith.constant 0 : index
    %c0_2 = arith.constant 0 : index
    %1 = vector.load %arg1[%c0_1, %c0_2] : memref<96x32xf32, #tpu.memory_space<vmem>>, vector<96x32xf32>
    %cst = arith.constant dense<0.000000e+00> : vector<16x32xf32>
    %2 = tpu.matmul %0, %1, %cst {dimension_numbers = #tpu.dot_dimension_numbers<[1], [0], [0], [1], [0, 0, 1, 1], [], []>} : vector<16x96xf32>, vector<96x32xf32>, vector<16x32xf32> -> vector<16x32xf32>
    %c0_3 = arith.constant 0 : index
    %c0_4 = arith.constant 0 : index
    %3 = vector.load %arg2[%c0_3, %c0_4] : memref<1x32xf32, #tpu.memory_space<vmem>>, vector<1x32xf32>
    %4 = vector.broadcast %3 : vector<1x32xf32> to vector<16x32xf32>
    %5 = arith.addf %2, %4 : vector<16x32xf32>
    %cst_5 = arith.constant dense<0.000000e+00> : vector<16x16xf32>
    %6 = tpu.matmul %5, %5, %cst_5 {dimension_numbers = #tpu.dot_dimension_numbers<[1], [1], [0], [0], [0, 0, 1, 0], [], []>} : vector<16x32xf32>, vector<16x32xf32>, vector<16x16xf32> -> vector<16x16xf32>
    %cst_6 = arith.constant dense<0xFF800000> : vector<16xf32>
    %7 = vector.multi_reduction <maximumf>, %6, %cst_6 [1] : vector<16x16xf32> to vector<16xf32>
    %8 = vector.shape_cast %7 : vector<16xf32> to vector<16x1xf32>
    %9 = vector.broadcast %8 : vector<16x1xf32> to vector<16x16xf32>
    %10 = arith.subf %6, %9 : vector<16x16xf32>
    %11 = math.exp %10 : vector<16x16xf32>
    %cst_7 = arith.constant dense<0.000000e+00> : vector<16xf32>
    %12 = vector.multi_reduction <add>, %11, %cst_7 [1] : vector<16x16xf32> to vector<16xf32>
    %13 = vector.shape_cast %12 : vector<16xf32> to vector<16x1xf32>
    %14 = tpu.reciprocal %13 {approx = true} : vector<16x1xf32> -> vector<16x1xf32>
    %15 = vector.broadcast %14 : vector<16x1xf32> to vector<16x16xf32>
    %16 = arith.mulf %11, %15 : vector<16x16xf32>
    %cst_8 = arith.constant 2.000000e-01 : f32
    %17 = vector.broadcast %cst_8 : f32 to vector<16x16xf32>
    %18 = arith.subf %16, %17 : vector<16x16xf32>
    %cst_9 = arith.constant 0.000000e+00 : f32
    %19 = vector.broadcast %cst_9 : f32 to vector<16x16xf32>
    %20 = arith.maximumf %18, %19 : vector<16x16xf32>
    %c0_10 = arith.constant 0 : index
    %c0_11 = arith.constant 0 : index
    %21 = vector.load %arg9[%c0_10, %c0_11] : memref<16x16xf32, #tpu.memory_space<vmem>>, vector<16x16xf32>
    tpu.vector_store %arg9[%c0_10, %c0_11], %20 {strides = array<i32>} : memref<16x16xf32, #tpu.memory_space<vmem>>, vector<16x16xf32>,
    %22 = tpu.iota {dimensions = array<i32: 0>} : vector<16x16xi32>
    %23 = tpu.iota {dimensions = array<i32: 1>} : vector<16x16xi32>
    %24 = arith.cmpi eq, %22, %23 : vector<16x16xi32>
    %cst_12 = arith.constant 1.000000e+00 : f32
    %cst_13 = arith.constant 0.000000e+00 : f32
    %25 = vector.broadcast %cst_12 : f32 to vector<16x16xf32>
    %26 = vector.broadcast %cst_13 : f32 to vector<16x16xf32>
    %27 = arith.select %24, %25, %26 : vector<16x16xi1>, vector<16x16xf32>
    %cst_14 = arith.constant 1.000000e+00 : f32
    %28 = vector.broadcast %cst_14 : f32 to vector<16x1xf32>
    %cst_15 = arith.constant 0.000000e+00 : f32
    %29 = vector.broadcast %cst_15 : f32 to vector<16x16xf32>
    %30 = arith.cmpf oeq, %20, %29 : vector<16x16xf32>
    %31 = arith.andi %24, %30 : vector<16x16xi1>
    %cst_16 = arith.constant 1.000000e+00 : f32
    %32 = vector.broadcast %cst_16 : f32 to vector<16x16xf32>
    %33 = arith.select %31, %32, %20 : vector<16x16xi1>, vector<16x16xf32>
    %cst_17 = arith.constant dense<0.000000e+00> : vector<16x1xf32>
    %34 = tpu.matmul %33, %28, %cst_17 {dimension_numbers = #tpu.dot_dimension_numbers<[0], [0], [1], [1], [0, 1, 1, 1], [], []>} : vector<16x16xf32>, vector<16x1xf32>, vector<16x1xf32> -> vector<16x1xf32>
    %35 = math.rsqrt %34 : vector<16x1xf32>
    %cst_18 = arith.constant dense<0.000000e+00> : vector<1x16xf32>
    %36 = tpu.matmul %35, %27, %cst_18 {dimension_numbers = #tpu.dot_dimension_numbers<[0], [0], [1], [1], [0, 1, 1, 1], [], []>} : vector<16x1xf32>, vector<16x16xf32>, vector<1x16xf32> -> vector<1x16xf32>
    %37 = vector.broadcast %35 : vector<16x1xf32> to vector<16x16xf32>
    %38 = arith.mulf %37, %33 : vector<16x16xf32>
    %39 = vector.broadcast %36 : vector<1x16xf32> to vector<16x16xf32>
    %40 = arith.mulf %38, %39 : vector<16x16xf32>
    %c0_19 = arith.constant 0 : index
    %c0_20 = arith.constant 0 : index
    %41 = vector.load %arg3[%c0_19, %c0_20] : memref<16x16xf32, #tpu.memory_space<vmem>>, vector<16x16xf32>
    %cst_21 = arith.constant 0.000000e+00 : f32
    %42 = vector.broadcast %cst_21 : f32 to vector<16x16xf32>
    %43 = arith.cmpf oeq, %41, %42 : vector<16x16xf32>
    %44 = arith.andi %24, %43 : vector<16x16xi1>
    %cst_22 = arith.constant 1.000000e+00 : f32
    %45 = vector.broadcast %cst_22 : f32 to vector<16x16xf32>
    %46 = arith.select %44, %45, %41 : vector<16x16xi1>, vector<16x16xf32>
    %cst_23 = arith.constant dense<0.000000e+00> : vector<16x1xf32>
    %47 = tpu.matmul %46, %28, %cst_23 {dimension_numbers = #tpu.dot_dimension_numbers<[0], [0], [1], [1], [0, 1, 1, 1], [], []>} : vector<16x16xf32>, vector<16x1xf32>, vector<16x1xf32> -> vector<16x1xf32>
    %48 = math.rsqrt %47 : vector<16x1xf32>
    %cst_24 = arith.constant dense<0.000000e+00> : vector<1x16xf32>
    %49 = tpu.matmul %48, %27, %cst_24 {dimension_numbers = #tpu.dot_dimension_numbers<[0], [0], [1], [1], [0, 1, 1, 1], [], []>} : vector<16x1xf32>, vector<16x16xf32>, vector<1x16xf32> -> vector<1x16xf32>
    %50 = vector.broadcast %48 : vector<16x1xf32> to vector<16x16xf32>
    %51 = arith.mulf %50, %46 : vector<16x16xf32>
    %52 = vector.broadcast %49 : vector<1x16xf32> to vector<16x16xf32>
    %53 = arith.mulf %51, %52 : vector<16x16xf32>
    %c0_i32 = arith.constant 0 : i32
    %54 = arith.index_cast %c0_i32 : i32 to index
    %c0_25 = arith.constant 0 : index
    %c0_26 = arith.constant 0 : index
    %55 = vector.load %arg4[%54, %c0_25, %c0_26] : memref<2x32x32xf32, #tpu.memory_space<vmem>>, vector<1x32x32xf32>
    %56 = vector.shape_cast %55 : vector<1x32x32xf32> to vector<32x32xf32>
    %cst_27 = arith.constant dense<0.000000e+00> : vector<16x32xf32>
    %57 = tpu.matmul %5, %56, %cst_27 {dimension_numbers = #tpu.dot_dimension_numbers<[1], [0], [0], [1], [0, 0, 1, 1], [], []>} : vector<16x32xf32>, vector<32x32xf32>, vector<16x32xf32> -> vector<16x32xf32>
    %cst_28 = arith.constant dense<0.000000e+00> : vector<16x32xf32>
    %58 = tpu.matmul %40, %57, %cst_28 {dimension_numbers = #tpu.dot_dimension_numbers<[0], [0], [1], [1], [0, 1, 1, 1], [], []>} : vector<16x16xf32>, vector<16x32xf32>, vector<16x32xf32> -> vector<16x32xf32>
    %59 = arith.index_cast %c0_i32 : i32 to index
    %c0_29 = arith.constant 0 : index
    %c0_30 = arith.constant 0 : index
    %60 = vector.load %arg5[%59, %c0_29, %c0_30] : memref<2x1x32xf32, #tpu.memory_space<vmem>>, vector<1x1x32xf32>
    %61 = vector.shape_cast %60 : vector<1x1x32xf32> to vector<1x32xf32>
    %62 = vector.broadcast %61 : vector<1x32xf32> to vector<16x32xf32>
    %63 = arith.addf %58, %62 : vector<16x32xf32>
    %cst_31 = arith.constant 0.899999976 : f32
    %64 = vector.broadcast %cst_31 : f32 to vector<16x32xf32>
    %65 = arith.mulf %64, %63 : vector<16x32xf32>
    %cst_32 = arith.constant 1.000000e-01 : f32
    %66 = vector.broadcast %cst_32 : f32 to vector<16x32xf32>
    %67 = arith.mulf %66, %5 : vector<16x32xf32>
    %68 = arith.addf %65, %67 : vector<16x32xf32>
    %c1_i32 = arith.constant 1 : i32
    %69 = arith.index_cast %c1_i32 : i32 to index
    %c0_33 = arith.constant 0 : index
    %c0_34 = arith.constant 0 : index
    %70 = vector.load %arg4[%69, %c0_33, %c0_34] : memref<2x32x32xf32, #tpu.memory_space<vmem>>, vector<1x32x32xf32>
    %71 = vector.shape_cast %70 : vector<1x32x32xf32> to vector<32x32xf32>
    %cst_35 = arith.constant dense<0.000000e+00> : vector<16x32xf32>
    %72 = tpu.matmul %68, %71, %cst_35 {dimension_numbers = #tpu.dot_dimension_numbers<[1], [0], [0], [1], [0, 0, 1, 1], [], []>} : vector<16x32xf32>, vector<32x32xf32>, vector<16x32xf32> -> vector<16x32xf32>
    %cst_36 = arith.constant dense<0.000000e+00> : vector<16x32xf32>
    %73 = tpu.matmul %40, %72, %cst_36 {dimension_numbers = #tpu.dot_dimension_numbers<[0], [0], [1], [1], [0, 1, 1, 1], [], []>} : vector<16x16xf32>, vector<16x32xf32>, vector<16x32xf32> -> vector<16x32xf32>
    %74 = arith.index_cast %c1_i32 : i32 to index
    %c0_37 = arith.constant 0 : index
    %c0_38 = arith.constant 0 : index
    %75 = vector.load %arg5[%74, %c0_37, %c0_38] : memref<2x1x32xf32, #tpu.memory_space<vmem>>, vector<1x1x32xf32>
    %76 = vector.shape_cast %75 : vector<1x1x32xf32> to vector<1x32xf32>
    %77 = vector.broadcast %76 : vector<1x32xf32> to vector<16x32xf32>
    %78 = arith.addf %73, %77 : vector<16x32xf32>
    %cst_39 = arith.constant 0.899999976 : f32
    %79 = vector.broadcast %cst_39 : f32 to vector<16x32xf32>
    %80 = arith.mulf %79, %78 : vector<16x32xf32>
    %cst_40 = arith.constant 1.000000e-01 : f32
    %81 = vector.broadcast %cst_40 : f32 to vector<16x32xf32>
    %82 = arith.mulf %81, %68 : vector<16x32xf32>
    %83 = arith.addf %80, %82 : vector<16x32xf32>
    %c2_i32 = arith.constant 2 : i32
    %c0_i32_41 = arith.constant 0 : i32
    %84 = arith.index_cast %c0_i32_41 : i32 to index
    %c0_42 = arith.constant 0 : index
    %c0_43 = arith.constant 0 : index
    %85 = vector.load %arg6[%84, %c0_42, %c0_43] : memref<2x32x32xf32, #tpu.memory_space<vmem>>, vector<1x32x32xf32>
    %86 = vector.shape_cast %85 : vector<1x32x32xf32> to vector<32x32xf32>
    %cst_44 = arith.constant dense<0.000000e+00> : vector<16x32xf32>
    %87 = tpu.matmul %5, %86, %cst_44 {dimension_numbers = #tpu.dot_dimension_numbers<[1], [0], [0], [1], [0, 0, 1, 1], [], []>} : vector<16x32xf32>, vector<32x32xf32>, vector<16x32xf32> -> vector<16x32xf32>
    %cst_45 = arith.constant dense<0.000000e+00> : vector<16x32xf32>
    %88 = tpu.matmul %53, %87, %cst_45 {dimension_numbers = #tpu.dot_dimension_numbers<[0], [0], [1], [1], [0, 1, 1, 1], [], []>} : vector<16x16xf32>, vector<16x32xf32>, vector<16x32xf32> -> vector<16x32xf32>
    %89 = arith.index_cast %c0_i32_41 : i32 to index
    %c0_46 = arith.constant 0 : index
    %c0_47 = arith.constant 0 : index
    %90 = vector.load %arg7[%89, %c0_46, %c0_47] : memref<2x1x32xf32, #tpu.memory_space<vmem>>, vector<1x1x32xf32>
    %91 = vector.shape_cast %90 : vector<1x1x32xf32> to vector<1x32xf32>
    %92 = vector.broadcast %91 : vector<1x32xf32> to vector<16x32xf32>
    %93 = arith.addf %88, %92 : vector<16x32xf32>
    %cst_48 = arith.constant 0.899999976 : f32
    %94 = vector.broadcast %cst_48 : f32 to vector<16x32xf32>
    %95 = arith.mulf %94, %93 : vector<16x32xf32>
    %cst_49 = arith.constant 1.000000e-01 : f32
    %96 = vector.broadcast %cst_49 : f32 to vector<16x32xf32>
    %97 = arith.mulf %96, %5 : vector<16x32xf32>
    %98 = arith.addf %95, %97 : vector<16x32xf32>
    %c1_i32_50 = arith.constant 1 : i32
    %99 = arith.index_cast %c1_i32_50 : i32 to index
    %c0_51 = arith.constant 0 : index
    %c0_52 = arith.constant 0 : index
    %100 = vector.load %arg6[%99, %c0_51, %c0_52] : memref<2x32x32xf32, #tpu.memory_space<vmem>>, vector<1x32x32xf32>
    %101 = vector.shape_cast %100 : vector<1x32x32xf32> to vector<32x32xf32>
    %cst_53 = arith.constant dense<0.000000e+00> : vector<16x32xf32>
    %102 = tpu.matmul %98, %101, %cst_53 {dimension_numbers = #tpu.dot_dimension_numbers<[1], [0], [0], [1], [0, 0, 1, 1], [], []>} : vector<16x32xf32>, vector<32x32xf32>, vector<16x32xf32> -> vector<16x32xf32>
    %cst_54 = arith.constant dense<0.000000e+00> : vector<16x32xf32>
    %103 = tpu.matmul %53, %102, %cst_54 {dimension_numbers = #tpu.dot_dimension_numbers<[0], [0], [1], [1], [0, 1, 1, 1], [], []>} : vector<16x16xf32>, vector<16x32xf32>, vector<16x32xf32> -> vector<16x32xf32>
    %104 = arith.index_cast %c1_i32_50 : i32 to index
    %c0_55 = arith.constant 0 : index
    %c0_56 = arith.constant 0 : index
    %105 = vector.load %arg7[%104, %c0_55, %c0_56] : memref<2x1x32xf32, #tpu.memory_space<vmem>>, vector<1x1x32xf32>
    %106 = vector.shape_cast %105 : vector<1x1x32xf32> to vector<1x32xf32>
    %107 = vector.broadcast %106 : vector<1x32xf32> to vector<16x32xf32>
    %108 = arith.addf %103, %107 : vector<16x32xf32>
    %cst_57 = arith.constant 0.899999976 : f32
    %109 = vector.broadcast %cst_57 : f32 to vector<16x32xf32>
    %110 = arith.mulf %109, %108 : vector<16x32xf32>
    %cst_58 = arith.constant 1.000000e-01 : f32
    %111 = vector.broadcast %cst_58 : f32 to vector<16x32xf32>
    %112 = arith.mulf %111, %98 : vector<16x32xf32>
    %113 = arith.addf %110, %112 : vector<16x32xf32>
    %c2_i32_59 = arith.constant 2 : i32
    %114 = arith.addf %83, %113 : vector<16x32xf32>
    %c0_60 = arith.constant 0 : index
    %c0_61 = arith.constant 0 : index
    %115 = vector.load %arg8[%c0_60, %c0_61] : memref<16x32xf32, #tpu.memory_space<vmem>>, vector<16x32xf32>
    tpu.vector_store %arg8[%c0_60, %c0_61], %114 {strides = array<i32>} : memref<16x32xf32, #tpu.memory_space<vmem>>, vector<16x32xf32>,
    return
  }
}

</mosaic_0001>

<bundles_post_ra>
// kernel: adaptive_graph_forward.1
= control target key start
LH: loop header
LB: loop body
LE: loop exit
PB: predicated region body
PF: predicated region fallthrough
CT: control target
= control target key end

     0   :  { %15 = vsyncpa [#allocation3], 0  ;;  %vm54_vm0 = vcmask 785408   ;;  %s2176_s0 = inlined_call_operand.vmem [shape: f32[16,96], index: 0, kind: input, shape index: {}]   ;;  %s2177_s1 = inlined_call_operand.vmem [shape: f32[96,32], index: 1, kind: input, shape index: {}]   ;;  %s2178_s2 = inlined_call_operand.vmem [shape: f32[1,32], index: 2, kind: input, shape index: {}]   ;;  %s2179_s3 = inlined_call_operand.vmem [shape: f32[16,16], index: 3, kind: input, shape index: {}]   ;;  %s2180_s4 = inlined_call_operand.vmem [shape: f32[2,32,32], index: 4, kind: input, shape index: {}]   ;;  %s2181_s5 = inlined_call_operand.vmem [shape: f32[2,1,32], index: 5, kind: input, shape index: {}]   ;;  %s2182_s6 = inlined_call_operand.vmem [shape: f32[2,32,32], index: 6, kind: input, shape index: {}]   ;;  %s2183_s7 = inlined_call_operand.vmem [shape: f32[2,1,32], index: 7, kind: input, shape index: {}]   ;;  %s2184_s8 = inlined_call_operand.hbm [shape: f32[16,32], index: 8, kind: output, shape index: {0}]   ;;  %s2185_s9 = inlined_call_operand.hbm [shape: f32[16,16], index: 9, kind: output, shape index: {1}]  }
   0x1   :  { %v46_v0 = vld [vmem:[%s2177_s1 + $0x58] sm:$0xff]  ;;  %v45_v1 = vld [vmem:[%s2177_s1 + $0x50] sm:$0xff]  ;;  %v44_v2 = vld [vmem:[%s2177_s1 + $0x48] sm:$0xff] }
   0x2   :  { %1661 = vmatprep.subr.mxu0 %v46_v0  ;;  %v43_v3 = vld [vmem:[%s2177_s1 + $0x40] sm:$0xff] }
   0x3   :  { %1662 = vmatpush3.msra.mxu0 %v46_v0  ;;  %v33_v4 = vld [vmem:[%s2176_s0] sm:$0xff] }
   0x4   :  { %1663 = vmatprep.subr.mxu0 %v45_v1  ;;  %1685 = vmatprep.mubr.msk.f32.mxu0 %vm54_vm0, %v33_v4 }
   0x5   :  { %1664 = vmatpush3.msra.mxu0 %v45_v1 }
   0x6   :  { %1665 = vmatprep.subr.mxu0 %v44_v2 }
   0x7   :  { %16 = vsyncpa [#allocation5], 0  ;;  %1666 = vmatpush3.msra.mxu0 %v44_v2  ;;  %v42_v5 = vld [vmem:[%s2177_s1 + $0x38] sm:$0xff]  ;;  %v41_v6 = vld [vmem:[%s2177_s1 + $0x30] sm:$0xff]  ;;  %vm136_vm1 = vcmask 261120   ;;  %vm218_vm2 = vcmask 130048   ;;  %v247_v39 = vlaneseq }
   0x8   :  { %1667 = vmatprep.subr.mxu0 %v43_v3  ;;  %v40_v7 = vld [vmem:[%s2177_s1 + $0x28] sm:$0xff]  ;;  %v39_v8 = vld [vmem:[%s2177_s1 + $0x20] sm:$0xff]  ;;  %v38_v9 = vld [vmem:[%s2177_s1 + $0x18] sm:$0xff]  ;;  %v1865_v50 = vmov 1.0   ;;  %v1866_v60 = vmov 0   ;;  %v1867_v61 = vmov 0.0  }
   0x9   :  { %1668 = vmatpush3.msra.mxu0 %v43_v3  ;;  %v37_v10 = vld [vmem:[%s2177_s1 + $0x10] sm:$0xff]  ;;  %v36_v11 = vld [vmem:[%s2177_s1 + $0x8] sm:$0xff]  ;;  %v35_v12 = vld [vmem:[%s2177_s1] sm:$0xff]  ;;  %v2006_v42 = vshrl.u32 %v247_v39, 7  ;;  %v2008_v43 = vand.u32 127, %v247_v39  ;;  %vm1868_vm13 = vmmov 0  }
   0xa   :  { %1669 = vmatprep.subr.mxu0 %v42_v5  ;;  %v34_v13 = vld [vmem:[%s2176_s0 + $0x8] sm:$0xff]  ;;  %v749_v14 = vld [vmem:[%s2180_s4 + $0x18] sm:$0xff]  ;;  %v748_v15 = vld [vmem:[%s2180_s4 + $0x10] sm:$0xff] }
   0xb   :  { %1670 = vmatpush3.msra.mxu0 %v42_v5  ;;  %v747_v16 = vld [vmem:[%s2180_s4 + $0x8] sm:$0xff]  ;;  %v746_v17 = vld [vmem:[%s2180_s4] sm:$0xff]  ;;  %vm252_vm3 = vcmp.eq.s32.totalorder %v2006_v42, %v2008_v43  ;;  %v2013_v48 = vadd.s32 8, %v2006_v42 }
   0xc   :  { %1671 = vmatprep.subr.mxu0 %v41_v6  ;;  %v1540_v18 = vld [vmem:[%s2178_s2] ss:$0 sm:$0xff]  ;;  %v501_v54 = vld [vmem:[%s2179_s3 + $0x8] sm:$0xff] }
   0xd   :  { %1672 = vmatpush3.msra.mxu0 %v41_v6  ;;  %vm253_vm6 = vcmp.eq.s32.totalorder %v2013_v48, %v2008_v43  ;;  %v500_v53 = vld [vmem:[%s2179_s3] sm:$0xff]  ;;  %vm503_vm11 = vcmp.eq.f32.partialorder %v501_v54, 0.0  ;;  %v496_v6 = vsub.s32 0, %v2006_v42 }
   0xe   :  { %1673 = vmatprep.subr.mxu0 %v40_v7  ;;  %vm502_vm9 = vcmp.eq.f32.partialorder %v500_v53, 0.0  ;;  %vm505_vm12 = vmand %vm253_vm6, %vm503_vm11 }
   0xf   :  { %1674 = vmatpush3.msra.mxu0 %v40_v7  ;;  %vm504_vm10 = vmand %vm252_vm3, %vm502_vm9  ;;  %v2047_v57 = vsel %vm505_vm12, 1.0, %v501_v54  ;;  %v1127_v54 = vld [vmem:[%s2182_s6 + $0x8] sm:$0xff] }
  0x10   :  { %1675 = vmatprep.subr.mxu0 %v39_v8  ;;  %v2041_v56 = vsel %vm504_vm10, 1.0, %v500_v53  ;;  %v1128_v53 = vld [vmem:[%s2182_s6 + $0x10] sm:$0xff] }
  0x11   :  { %1676 = vmatpush3.msra.mxu0 %v39_v8 }
  0x12   :  { %1677 = vmatprep.subr.mxu0 %v38_v9 }
  0x13   :  { %1678 = vmatpush3.msra.mxu0 %v38_v9 }
  0x14   :  { %1679 = vmatprep.subr.mxu0 %v37_v10 }
  0x15   :  { %1680 = vmatpush3.msra.mxu0 %v37_v10 }
  0x16   :  { %1681 = vmatprep.subr.mxu0 %v36_v11 }
  0x17   :  { %1682 = vmatpush3.msra.mxu0 %v36_v11 }
  0x18   :  { %1683 = vmatprep.subr.mxu0 %v35_v12 }
  0x19   :  { %1684 = vmatpush3.msra.mxu0 %v35_v12 }
  0x1a   :  { %1686 = vmatmul.mubr.msk.f32.vlgmr.msra.gmra.mxu0 %vm54_vm0, %v34_v13  ;;  %1723 = vmatprep.subr.mxu0 %v749_v14 }
  0x1b   :  { %1724 = vmatpush3.msra.mxu0 %v749_v14 }
  0x1c   :  { %1725 = vmatprep.subr.mxu0 %v748_v15 }
  0x1d   :  { %1726 = vmatpush3.msra.mxu0 %v748_v15 }
  0x1e   :  { %1727 = vmatprep.subr.mxu0 %v747_v16 }
  0x1f   :  { %1728 = vmatpush3.msra.mxu0 %v747_v16 }
  0x20   :  { %1729 = vmatprep.subr.mxu0 %v746_v17 }
  0x21   :  { %1730 = vmatpush3.msra.mxu0 %v746_v17 }
  0xda   :  { %v1687_v19 = vpop.f32.mrf.mxu0 }
  0xdb   :  { %v1982_v20 = vadd.f32 %v1687_v19, %v1540_v18 }
  0xdc   :  { %v127_v21 = vpop.f32.mrf.mxu0 }
  0xdd   :  { %v1984_v22 = vadd.f32 %v1540_v18, %v127_v21  ;;  %1688 = vmatprep.subr.msk.mxu1 %vm136_vm1, %v1982_v20 }
  0xde   :  { %1689 = vmatpush3.xpose.msk.msra.mxu1 %vm136_vm1, %v1982_v20 }
  0xdf   :  { %1690 = vmatprep.subr.msk.mxu1 %vm136_vm1, %v1984_v22  ;;  %1692 = vmatprep.mubr.msk.f32.mxu1 %vm136_vm1, %v1984_v22 }
  0xe0   :  { %1731 = vmatprep.mubr.msk.f32.mxu0 %vm136_vm1, %v1984_v22 }
  0xe1   :  { %1732 = vmatmul.mubr.msk.f32.vlgmr.msra.gmra.mxu0 %vm136_vm1, %v1982_v20 }
  0xe2   :  { %1691 = vmatpush3.xpose.msk.msra.mxu1 %vm136_vm1, %v1984_v22 }
  0xe3   :  { %1695 = vmatprep.subr.mxu1 %v1865_v50 }
  0xe5   :  { %1693 = vmatmul.mubr.msk.f32.vlgmr.msra.gmra.mxu1 %vm136_vm1, %v1982_v20 }
  0xe6   :  { %1696 = vmatpush3.msra.mxu1 %v1865_v50 }
  0xe7   :  { %1697 = vmatprep.subr.mxu1 %v1865_v50 }
  0xe8   :  { %1698 = vmatpush3.msra.mxu1 %v1865_v50 }
  0xe9   :  { %1702 = vmatprep.subr.mxu1 %v1867_v61 }
 0x1a1   :  { %v1733_v5 = vpop.f32.mrf.mxu0 }
 0x1a5   :  { %v1694_v23 = vpop.f32.mrf.mxu1 }
 0x1a6   :  { %v222_v26 = vsel %vm218_vm2, %v1694_v23, -inf }
 0x1a7   :  { %v209_v24 = vpop.f32.mrf.mxu1 }
 0x1a8   :  { %v219_v25 = vsel %vm218_vm2, %v209_v24, -inf }
 0x1a9   :  { %220 = vmax.xlane.f32.xlu0 %v219_v25 }
 0x1ad   :  { %223 = vmax.xlane.f32.xlu0 %v222_v26  ;;  %v1567_v26 = vld [vmem:[%s2180_s4 + $0x38] sm:$0xff] }
 0x232   :  { %v221_v27 = vpop.xlane.xlu0 %220 }
 0x233   :  { %v225_v28 = vsub.f32 %v209_v24, %v221_v27  ;;  %v816_v24 = vpop.f32.mrf.mxu0  ;;  %v1566_v27 = vld [vmem:[%s2180_s4 + $0x30] sm:$0xff] }
 0x235   :  { %v227_v29 = vmul.f32 1.442695, %v225_v28  ;;  %v1565_v28 = vld [vmem:[%s2180_s4 + $0x28] sm:$0xff] }
 0x236   :  { %v224_v30 = vpop.xlane.xlu0 %223 }
 0x237   :  { %1805 = vpow2.f32 %v227_v29  ;;  %v226_v31 = vsub.f32 %v1694_v23, %v224_v30  ;;  %v1564_v29 = vld [vmem:[%s2180_s4 + $0x20] sm:$0xff] }
 0x239   :  { %v229_v32 = vmul.f32 1.442695, %v226_v31 }
 0x23b   :  { %1807 = vpow2.f32 %v229_v32 }
 0x244   :  { %v1806_v33 = vpop.eup %1805 }
 0x245   :  { %v231_v34 = vsel %vm218_vm2, %v1806_v33, 0.0 }
 0x246   :  { %232 = vadd.xlane.f32.xlu1 %v231_v34 }
 0x248   :  { %v1808_v35 = vpop.eup %1807 }
 0x249   :  { %v234_v36 = vsel %vm218_vm2, %v1808_v35, 0.0 }
 0x24a   :  { %235 = vadd.xlane.f32.xlu1 %v234_v36  ;;  %v1561_v36 = vld [vmem:[%s2181_s5] ss:$0 sm:$0xff] }
 0x2cf   :  { %v233_v37 = vpop.xlane.xlu1 %232 }
 0x2d0   :  { %1809 = vrcp.f32 %v233_v37 }
 0x2d3   :  { %v236_v38 = vpop.xlane.xlu1 %235 }
 0x2d4   :  { %1811 = vrcp.f32 %v236_v38 }
 0x2dd   :  { %v1810_v40 = vpop.eup %1809 }
 0x2de   :  { %v239_v41 = vmul.f32 %v1810_v40, %v1806_v33 }
 0x2e0   :  { %v1547_v44 = vadd.f32 -0.2, %v239_v41 }
 0x2e1   :  { %v1812_v45 = vpop.eup %1811 }
 0x2e2   :  { %v243_v46 = vmax.f32 %v1547_v44, 0.0  ;;  %v240_v47 = vmul.f32 %v1812_v45, %v1808_v35 }
 0x2e4   :  { %vm256_vm4 = vcmp.eq.f32.partialorder %v243_v46, 0.0  ;;  %245 = vst.msk [vmem:[#allocation4] sm:$0xff] %vm218_vm2, %v243_v46  ;;  %v1548_v49 = vadd.f32 -0.2, %v240_v47  ;;  %v2104_v47 = vmul.f32 0.1, %v1982_v20 }
 0x2e5   :  { %vm258_vm5 = vmand %vm252_vm3, %vm256_vm4 }
 0x2e6   :  { %v2021_v51 = vsel %vm258_vm5, 1.0, %v243_v46  ;;  %v244_v52 = vmax.f32 %v1548_v49, 0.0  ;;  %v2101_v46 = vmul.f32 0.1, %v1984_v22 }
 0x2e7   :  { %262 = vxpose.xlu0.b32.start [1/2] (short) (narrow) %v2021_v51, 16 }
 0x2e8   :  { %vm257_vm7 = vcmp.eq.f32.partialorder %v244_v52, 0.0  ;;  %246 = vst.msk [vmem:[#allocation4 + $0x8] sm:$0xff] %vm218_vm2, %v244_v52 }
 0x2e9   :  { %vm259_vm8 = vmand %vm253_vm6, %vm257_vm7 }
 0x2ea   :  { %v261_v55 = vsel %vm259_vm8, 1.0, %v244_v52  ;;  %v1129_v52 = vld [vmem:[%s2182_s6 + $0x18] sm:$0xff] }
 0x2eb   :  { %263 = vxpose.xlu0.b32.end [2/2] (short) (narrow) %v261_v55, 16 }
 0x2ef   :  { %508 = vxpose.xlu0.b32.start [1/2] (short) (narrow) %v2041_v56, 16 }
 0x2f3   :  { %509 = vxpose.xlu0.b32.end [2/2] (short) (narrow) %v2047_v57, 16 }
 0x31c   :  { %1804 = vset.pattern.permute.xlu0 %v1866_v60 }
 0x363   :  { %v278_v58 = vpop.trf.xlu0 }
 0x364   :  { %1699 = vmatprep.mubr.msk.f32.mxu1 %vm218_vm2, %v278_v58 }
 0x367   :  { %v279_v59 = vpop.trf.xlu0 }
 0x368   :  { %1700 = vmatmul.mubr.msk.f32.vlgmr.msra.gmra.mxu1 %vm218_vm2, %v279_v59 }
 0x369   :  { %1703 = vmatpush3.msk.msra.mxu1 %vm253_vm6, %v1865_v50  ;;  %1706 = vmatprep.mubr.msk.f32.mxu1 %vm1868_vm13, %v1867_v61 }
 0x36a   :  { %1704 = vmatprep.subr.mxu1 %v1867_v61 }
 0x36b   :  { %1705 = vmatpush3.msk.msra.mxu1 %vm252_vm3, %v1865_v50  ;;  %v524_v2 = vpop.trf.xlu0 }
 0x36c   :  { %1709 = vmatprep.subr.mxu1 %v1865_v50 }
 0x36f   :  { %v525_v4 = vpop.trf.xlu0 }
 0x428   :  { %v1701_v62 = vpop.f32.mrf.mxu1 }
 0x429   :  { %1813 = vrsqrt.f32 %v1701_v62 }
 0x42a   :  { %v366_v63 = vpop.f32.mrf.mxu1 }
 0x42b   :  { %1815 = vrsqrt.f32 %v366_v63 }
 0x436   :  { %v1814_v0 = vpop.eup %1813 }
 0x437   :  { %489 = vperm.xlu0 %1804, %v1814_v0  }
 0x438   :  { %v1816_v1 = vpop.eup %1815 }
 0x439   :  { %377 = vxpose.xlu1.b32.start [1/2] (short) (narrow) %v1816_v1, 8 }
 0x43d   :  { %378 = vxpose.xlu1.b32.end [2/2] (short) (narrow) %v1814_v0, 8 }
 0x45b   :  { %1803 = vset.pattern.permute.xlu1 %v1866_v60 }
 0x45c   :  { %484 = vperm.xlu1 %1803, %v1816_v1  }
 0x4b2   :  { %v490_v11 = vpop.permute.xlu0 %489 }
 0x4b3   :  { %v493_v15 = vmul.f32 %v490_v11, %v261_v55  ;;  %v1126_v55 = vld [vmem:[%s2182_s6] sm:$0xff] }
 0x4b5   :  { %v393_v3 = vpop.trf.xlu1 }
 0x4b6   :  { %1707 = vmatmul.mubr.msk.f32.vlgmr.msra.gmra.mxu1 %vm218_vm2, %v393_v3 }
 0x4b7   :  { %1710 = vmatpush3.msra.mxu1 %v1865_v50  ;;  %1713 = vmatprep.mubr.msk.f32.mxu1 %vm218_vm2, %v524_v2 }
 0x4b8   :  { %1711 = vmatprep.subr.mxu1 %v1865_v50 }
 0x4b9   :  { %1712 = vmatpush3.msra.mxu1 %v1865_v50 }
 0x4ba   :  { %1716 = vmatprep.subr.mxu1 %v1867_v61  ;;  %1714 = vmatmul.mubr.msk.f32.vlgmr.msra.gmra.mxu1 %vm218_vm2, %v525_v4 }
 0x4bb   :  { %1717 = vmatpush3.msk.msra.mxu1 %vm253_vm6, %v1865_v50  ;;  %1720 = vmatprep.mubr.msk.f32.mxu1 %vm1868_vm13, %v1867_v61 }
 0x4bc   :  { %1718 = vmatprep.subr.mxu1 %v1867_v61 }
 0x4bd   :  { %1719 = vmatpush3.msk.msra.mxu1 %vm252_vm3, %v1865_v50 }
 0x4be   :  { %1734 = vmatprep.subr.mxu1 %v1733_v5 }
 0x4d7   :  { %v485_v7 = vpop.permute.xlu1 %484 }
 0x4d8   :  { %v492_v9 = vmul.f32 %v485_v7, %v2021_v51  ;;  %v1580_v7 = vld [vmem:[%s2182_s6 + $0x28] sm:$0xff] }
 0x576   :  { %v478_v8 = vpop.f32.mrf.mxu1 }
 0x577   :  { %v497_v10 = vrot.slane %v478_v8, %v496_v6  ;;  %v1579_v8 = vld [vmem:[%s2182_s6 + $0x20] sm:$0xff] }
 0x578   :  { %v1708_v12 = vpop.f32.mrf.mxu1 }
 0x579   :  { %v498_v13 = vmul.f32 %v497_v10, %v492_v9  ;;  %v499_v17 = vmul.f32 %v497_v10, %v493_v15  ;;  %v1576_v9 = vld [vmem:[%s2183_s7] ss:$0 sm:$0xff] }
 0x57a   :  { %v1715_v14 = vpop.f32.mrf.mxu1 }
 0x57b   :  { %832 = vxpose.xlu0.b32.start [1/2] (short) (narrow) %v498_v13, 16 }
 0x57c   :  { %v612_v16 = vpop.f32.mrf.mxu1 }
 0x57d   :  { %1817 = vrsqrt.f32 %v612_v16 }
 0x57e   :  { %1819 = vrsqrt.f32 %v1715_v14 }
 0x57f   :  { %833 = vxpose.xlu0.b32.end [2/2] (short) (narrow) %v499_v17, 16 }
 0x58a   :  { %v1818_v18 = vpop.eup %1817 }
 0x58b   :  { %623 = vxpose.xlu1.b32.start [1/2] (short) (narrow) %v1818_v18, 8  ;;  %v1820_v19 = vpop.eup %1819 }
 0x58f   :  { %624 = vxpose.xlu1.b32.end [2/2] (short) (narrow) %v1820_v19, 8 }
 0x5a8   :  { %735 = vperm.xlu0 %1804, %v1820_v19  }
 0x5ad   :  { %730 = vperm.xlu1 %1803, %v1818_v18  }
 0x5f7   :  { %v848_v21 = vpop.trf.xlu0 }
 0x5f8   :  { %1756 = vmatprep.mubr.msk.f32.mxu0 %vm218_vm2, %v848_v21 }
 0x5fb   :  { %v849_v25 = vpop.trf.xlu0 }
 0x607   :  { %v639_v23 = vpop.trf.xlu1 }
 0x608   :  { %1721 = vmatmul.mubr.msk.f32.vlgmr.msra.gmra.mxu1 %vm218_vm2, %v639_v23 }
 0x609   :  { %1735 = vmatpush3.msra.mxu1 %v1733_v5  ;;  %1738 = vmatprep.mubr.msk.f32.mxu1 %vm218_vm2, %v848_v21  ;;  %v1582_v5 = vld [vmem:[%s2182_s6 + $0x38] sm:$0xff] }
 0x60a   :  { %1736 = vmatprep.subr.mxu1 %v816_v24 }
 0x60b   :  { %1737 = vmatpush3.msra.mxu1 %v816_v24 }
 0x60c   :  { %1739 = vmatmul.mubr.msk.f32.vlgmr.msra.gmra.mxu1 %vm218_vm2, %v849_v25  ;;  %1741 = vmatprep.subr.mxu1 %v1567_v26 }
 0x60d   :  { %1742 = vmatpush3.msra.mxu1 %v1567_v26 }
 0x60e   :  { %1743 = vmatprep.subr.mxu1 %v1566_v27 }
 0x60f   :  { %1744 = vmatpush3.msra.mxu1 %v1566_v27 }
 0x610   :  { %1745 = vmatprep.subr.mxu1 %v1565_v28 }
 0x611   :  { %1746 = vmatpush3.msra.mxu1 %v1565_v28 }
 0x612   :  { %1747 = vmatprep.subr.mxu1 %v1564_v29 }
 0x613   :  { %1748 = vmatpush3.msra.mxu1 %v1564_v29 }
 0x623   :  { %v736_v34 = vpop.permute.xlu0 %735 }
 0x624   :  { %v739_v39 = vmul.f32 %v736_v34, %v2047_v57 }
 0x628   :  { %v731_v30 = vpop.permute.xlu1 %730 }
 0x629   :  { %v738_v32 = vmul.f32 %v731_v30, %v2041_v56 }
 0x6c8   :  { %v724_v31 = vpop.f32.mrf.mxu1 }
 0x6c9   :  { %v743_v33 = vrot.slane %v724_v31, %v496_v6  ;;  %v1581_v6 = vld [vmem:[%s2182_s6 + $0x30] sm:$0xff]  ;;  %s1869_s6 = smov [#allocation4]  }
 0x6ca   :  { %v1722_v35 = vpop.f32.mrf.mxu1  ;;  %s1525_s29 = sshll.u32 %s1869_s6, 4  ;;  %s1526_s29 = int_to_ptr.vmem [resolvable:$true] %s1525_s29 }
 0x6cb   :  { %v744_v37 = vmul.f32 %v743_v33, %v738_v32  ;;  %v745_v42 = vmul.f32 %v743_v33, %v739_v39  ;;  %s1821_s30 = scalar_lea.vmem %s1526_s29, 256  ;;  %p1826_p1 = scmp.lt.s32.totalorder %s1526_s29, %s1526_s29 }
 0x6cc   :  { %v1740_v38 = vpop.f32.mrf.mxu1  ;;  %p1822_p0 = scmp.ne.s32.totalorder %s1526_s29, %s1821_s30  ;;  %p1827_p2 = scmp.lt.s32.totalorder %s1821_s30, %s1821_s30 }
 0x6cd   :  { %v942_v40 = vadd.f32 %v1740_v38, %v1561_v36  ;;  %1212 = vxpose.xlu1.b32.start [1/2] (short) (narrow) %v744_v37, 16 }
 0x6ce   :  { %v936_v41 = vpop.f32.mrf.mxu1  ;;  %p1828_p3 = por %p1827_p2, %p1826_p1 }
 0x6cf   :  { %v937_v43 = vadd.f32 %v1561_v36, %v936_v41  ;;  %v946_v44 = vmul.f32 0.9, %v942_v40 }
 0x6d0   :  { %p1829_p4 = pnand %p1828_p3, %p1822_p0 }
 0x6d1   :  { %v945_v45 = vmul.f32 0.9, %v937_v43  ;;  %1213 = vxpose.xlu1.b32.end [2/2] (short) (narrow) %v745_v42, 16  ;;  %v950_v49 = vadd.f32 %v2104_v47, %v946_v44 }
 0x6d3   :  { %v949_v48 = vadd.f32 %v2101_v46, %v945_v45  ;;  %v1123_v61 = vmul.f32 0.1, %v950_v49 }
 0x6d5   :  { %1749 = vmatprep.mubr.msk.f32.mxu1 %vm136_vm1, %v949_v48  ;;  %v1122_v1 = vmul.f32 0.1, %v949_v48 }
 0x6d6   :  { %1750 = vmatmul.mubr.msk.f32.vlgmr.msra.gmra.mxu1 %vm136_vm1, %v950_v49 }
 0x749   :  { %v1228_v56 = vpop.trf.xlu1 }
 0x74a   :  { %1774 = vmatprep.mubr.msk.f32.mxu1 %vm218_vm2, %v1228_v56 }
 0x74d   :  { %v1229_v4 = vpop.trf.xlu1 }
 0x796   :  { %v1751_v50 = vpop.f32.mrf.mxu1 }
 0x797   :  { %1752 = vmatprep.subr.mxu0 %v1751_v50 }
 0x798   :  { %v1028_v51 = vpop.f32.mrf.mxu1  ;;  %1753 = vmatpush3.msra.mxu0 %v1751_v50 }
 0x799   :  { %1754 = vmatprep.subr.mxu0 %v1028_v51 }
 0x79a   :  { %1755 = vmatpush3.msra.mxu0 %v1028_v51 }
 0x79b   :  { %1757 = vmatmul.mubr.msk.f32.vlgmr.msra.gmra.mxu0 %vm218_vm2, %v849_v25  ;;  %1759 = vmatprep.subr.mxu0 %v1129_v52 }
 0x79c   :  { %1760 = vmatpush3.msra.mxu0 %v1129_v52  ;;  %1767 = vmatprep.mubr.msk.f32.mxu0 %vm136_vm1, %v1984_v22  ;;  %v1571_v22 = vld [vmem:[%s2181_s5 + $0x1] ss:$0 sm:$0xff] }
 0x79d   :  { %1761 = vmatprep.subr.mxu0 %v1128_v53 }
 0x79e   :  { %1762 = vmatpush3.msra.mxu0 %v1128_v53 }
 0x79f   :  { %1763 = vmatprep.subr.mxu0 %v1127_v54 }
 0x7a0   :  { %1764 = vmatpush3.msra.mxu0 %v1127_v54 }
 0x7a1   :  { %1765 = vmatprep.subr.mxu0 %v1126_v55 }
 0x7a2   :  { %1766 = vmatpush3.msra.mxu0 %v1126_v55 }
 0x7a3   :  { %1768 = vmatmul.mubr.msk.f32.vlgmr.msra.gmra.mxu0 %vm136_vm1, %v1982_v20 }
 0x7a4   :  { %1792 = vmatprep.mubr.msk.f32.mxu0 %vm218_vm2, %v1228_v56 }
 0x85b   :  { %v1758_v57 = vpop.f32.mrf.mxu0 }
 0x85c   :  { %v1117_v58 = vadd.f32 %v1758_v57, %v1571_v22 }
 0x85d   :  { %v1111_v59 = vpop.f32.mrf.mxu0 }
 0x85e   :  { %v1121_v60 = vmul.f32 0.9, %v1117_v58  ;;  %v1112_v62 = vadd.f32 %v1571_v22, %v1111_v59 }
 0x860   :  { %v2132_v63 = vadd.f32 %v1123_v61, %v1121_v60  ;;  %v1120_v0 = vmul.f32 0.9, %v1112_v62 }
 0x862   :  { %v2134_v20 = vadd.f32 %v1122_v1, %v1120_v0 }
 0x863   :  { %v1769_v2 = vpop.f32.mrf.mxu0 }
 0x864   :  { %1770 = vmatprep.subr.mxu1 %v1769_v2 }
 0x865   :  { %v1196_v3 = vpop.f32.mrf.mxu0  ;;  %1771 = vmatpush3.msra.mxu1 %v1769_v2 }
 0x866   :  { %1772 = vmatprep.subr.mxu1 %v1196_v3 }
 0x867   :  { %1773 = vmatpush3.msra.mxu1 %v1196_v3 }
 0x868   :  { %1775 = vmatmul.mubr.msk.f32.vlgmr.msra.gmra.mxu1 %vm218_vm2, %v1229_v4  ;;  %1777 = vmatprep.subr.mxu1 %v1582_v5 }
 0x869   :  { %1778 = vmatpush3.msra.mxu1 %v1582_v5 }
 0x86a   :  { %1779 = vmatprep.subr.mxu1 %v1581_v6 }
 0x86b   :  { %1780 = vmatpush3.msra.mxu1 %v1581_v6 }
 0x86c   :  { %1781 = vmatprep.subr.mxu1 %v1580_v7 }
 0x86d   :  { %1782 = vmatpush3.msra.mxu1 %v1580_v7 }
 0x86e   :  { %1783 = vmatprep.subr.mxu1 %v1579_v8 }
 0x86f   :  { %1784 = vmatpush3.msra.mxu1 %v1579_v8 }
 0x928   :  { %v1776_v10 = vpop.f32.mrf.mxu1 }
 0x929   :  { %v1322_v11 = vadd.f32 %v1776_v10, %v1576_v9 }
 0x92a   :  { %v1316_v12 = vpop.f32.mrf.mxu1 }
 0x92b   :  { %v1317_v13 = vadd.f32 %v1576_v9, %v1316_v12  ;;  %v1326_v14 = vmul.f32 0.9, %v1322_v11 }
 0x92d   :  { %v1325_v15 = vmul.f32 0.9, %v1317_v13  ;;  %v1328_v17 = vadd.f32 %v1326_v14, %v2104_v47 }
 0x92f   :  { %v1327_v16 = vadd.f32 %v1325_v15, %v2101_v46 }
 0x931   :  { %1785 = vmatprep.mubr.msk.f32.mxu1 %vm136_vm1, %v1327_v16 }
 0x932   :  { %1786 = vmatmul.mubr.msk.f32.vlgmr.msra.gmra.mxu1 %vm136_vm1, %v1328_v17 }
 0x9f2   :  { %v1787_v18 = vpop.f32.mrf.mxu1 }
 0x9f3   :  { %1788 = vmatprep.subr.mxu0 %v1787_v18 }
 0x9f4   :  { %v1406_v19 = vpop.f32.mrf.mxu1  ;;  %1789 = vmatpush3.msra.mxu0 %v1787_v18 }
 0x9f5   :  { %1790 = vmatprep.subr.mxu0 %v1406_v19 }
 0x9f6   :  { %1791 = vmatpush3.msra.mxu0 %v1406_v19 }
 0x9f7   :  { %1793 = vmatmul.mubr.msk.f32.vlgmr.msra.gmra.mxu0 %vm218_vm2, %v1229_v4 }
 0x9f8   :  { %1832 = shalt.err (!%p1829_p4)
}
 0x9f9   :  { %s1870_s10 = smov 128   ;;  %s1871_s11 = smov 8   ;;  %v1586_v21 = vld [vmem:[%s2183_s7 + $0x1] ss:$0 sm:$0xff]  ;;  %v1501_v27 = vmul.f32 0.1, %v1328_v17 }
 0x9fa   :  { %1531 = dma.vmem_to_hbm [thread:$0]  %s1526_s29, 256, %s2185_s9, [#allocation5], %s1870_s10, %s1870_s10, %s1871_s11   ;;  %v1500_v31 = vmul.f32 0.1, %v1327_v16 }
 0x9fb   :  { %s1872_s15 = smov [#allocation2]  }
 0x9fc   :  { %s1513_s16 = sshll.u32 %s1872_s15, 4  ;;  %s1514_s16 = int_to_ptr.vmem [resolvable:$true] %s1513_s16 }
 0x9fd   :  { %s1841_s7 = scalar_lea.vmem %s1514_s16, 256  ;;  %p1846_p6 = scmp.lt.s32.totalorder %s1514_s16, %s1514_s16 }
 0x9fe   :  { %p1842_p5 = scmp.ne.s32.totalorder %s1514_s16, %s1841_s7  ;;  %p1847_p7 = scmp.lt.s32.totalorder %s1841_s7, %s1841_s7 }
 0xa00   :  { %p1848_p8 = por %p1847_p7, %p1846_p6 }
 0xa02   :  { %p1849_p9 = pnand %p1848_p8, %p1842_p5 }
 0xab7   :  { %v1794_v23 = vpop.f32.mrf.mxu0 }
 0xab8   :  { %v1495_v24 = vadd.f32 %v1794_v23, %v1586_v21 }
 0xab9   :  { %v1489_v25 = vpop.f32.mrf.mxu0 }
 0xaba   :  { %v1499_v26 = vmul.f32 0.9, %v1495_v24  ;;  %v1490_v28 = vadd.f32 %v1586_v21, %v1489_v25 }
 0xabc   :  { %v1503_v29 = vadd.f32 %v1501_v27, %v1499_v26  ;;  %v1498_v30 = vmul.f32 0.9, %v1490_v28 }
 0xabe   :  { %v1505_v32 = vadd.f32 %v1503_v29, %v2132_v63  ;;  %v1502_v33 = vadd.f32 %v1500_v31, %v1498_v30 }
 0xac0   :  { %1507 = vst.msk [vmem:[#allocation2 + $0x8] sm:$0xff] %vm136_vm1, %v1505_v32  ;;  %v1504_v34 = vadd.f32 %v1502_v33, %v2134_v20 }
 0xac2   :  { %1506 = vst.msk [vmem:[#allocation2] sm:$0xff] %vm136_vm1, %v1504_v34 }
 0xac3   :  { %1852 = shalt.err (!%p1849_p9)
}
 0xac4   :  { %1519 = dma.vmem_to_hbm [thread:$0]  %s1514_s16, 256, %s2184_s8, [#allocation3], %s1870_s10, %s1870_s10, %s1871_s11  }
 0xac5   :  { %1861 = dma.done.wait [#allocation3], 256  }
 0xac6   :  { %1862 = vsyncadd [#allocation3], 4294967040 }
 0xac7   :  { %1863 = dma.done.wait [#allocation5], 256  }
 0xac8   :  { %1864 = vsyncadd [#allocation5], 4294967040 }
 0xac9   :  { %1538 = vsyncpa [#allocation3], 1 }
 0xaca   :  { %1539 = vsyncpa [#allocation5], 1 }

</bundles_post_ra>
